<compile_context>
chip_gen: v7x
topology: tpu7x:2x2x1
jax: 0.10.0
libtpu: 0.0.40
codegen_flags: <defaults>
</compile_context>

<pallas_src>
import jax
import jax.numpy as jnp
from jax import lax
from jax.experimental import pallas as pl
from jax.experimental.pallas import tpu as pltpu

_LANE = 128


def _round_up(x: int, m: int) -> int:
    return (x + m - 1) // m * m


def _cdiv(a: int, b: int) -> int:
    return (a + b - 1) // b


def _logreg_kernel(x_ref, w_ref, b_ref, o_ref):
    # x_ref: [TILE_B, F_pad]  streaming tile (VMEM, pipelined/double-buffered)
    # w_ref: [1, F_pad]       weight, VMEM-resident across all grid steps
    # b_ref: [1]              bias scalar in SMEM
    # o_ref: [1, TILE_B]      lane-dense output tile
    z = lax.dot_general(
        w_ref[...], x_ref[...],
        dimension_numbers=(((1,), (1,)), ((), ())),   # contract F of both
        preferred_element_type=jnp.float32,
    )                                                  # -> (1, TILE_B)
    o_ref[...] = jax.nn.sigmoid(z + b_ref[0]).astype(o_ref.dtype)


def logistic_regression(x, weight, bias):
    """sigmoid(x @ weight.T + bias).

    x: [B, F] f32, weight: [1, F] f32 (PyTorch nn.Linear layout), bias: [1] f32.
    Returns [B, 1] f32.
    """
    B, F = x.shape
    x = x.astype(jnp.float32)
    weight = weight.astype(jnp.float32).reshape(1, F)
    bias = bias.astype(jnp.float32).reshape(1)

    # --- F (lane) padding only when needed.  Padded weight columns are zero,
    # so padded x columns (also zero) cannot inject NaN/Inf into valid rows.
    if F % _LANE:
        F_pad = _round_up(F, _LANE)
        x = jnp.pad(x, ((0, 0), (0, F_pad - F)))
        weight = jnp.pad(weight, ((0, 0), (0, F_pad - F)))
    else:
        F_pad = F                      # aligned fast path: no x copy through HBM

    # --- per-generation VMEM budget: 128 MiB on v5e/v6e, 64 MiB per TC on v7x.
    try:
        vmem_cap = int(pltpu.get_tpu_info().vmem_capacity_bytes)
    except Exception:
        vmem_cap = 64 << 20            # safe fallback: smallest per-core VMEM (v7x)
    vmem_limit = max(32 << 20, min(vmem_cap - (16 << 20), 64 << 20))
    per_buf = min(vmem_limit // 3, 16 << 20)   # x is double-buffered + headroom

    # --- batch tiling: biggest lane-multiple tile that fits the byte budget.
    # No batch padding: grid = cdiv(B, tile_b); the ragged last block's garbage
    # rows only affect masked (never-stored) output lanes.
    rows = max(_LANE, (per_buf // (F_pad * 4)) // _LANE * _LANE)
    tile_b = min(rows, _round_up(B, _LANE))
    if _cdiv(B, tile_b) == 1 and B > 4 * _LANE:
        # Ensure >= 2 tiles for sizeable batches so both v7x TensorCores get a
        # batch tile (measured no-op on v5e/v6e single-TC chips).
        tile_b = _round_up(_cdiv(B, 2), _LANE)
    num_tiles = _cdiv(B, tile_b)

    # TODO(synk): for very wide F (a single (tile_b, F_pad) tile no longer fits
    # the per-chip VMEM budget) add a second "arbitrary" grid axis over F with
    # an f32 VMEM accumulator (init/finalize via pl.when).
    # TODO(synk): if a v7x trace shows exposed DMA gaps between grid steps, add
    # pipeline_mode=pl.Buffered(3) on the x BlockSpec and shrink per_buf to
    # keep 3 buffers inside the 48 MiB budget.
    out = pl.pallas_call(
        _logreg_kernel,
        out_shape=jax.ShapeDtypeStruct((1, B), jnp.float32),
        grid_spec=pltpu.PrefetchScalarGridSpec(
            num_scalar_prefetch=0,
            grid=(num_tiles,),
            in_specs=[
                pl.BlockSpec((tile_b, F_pad), lambda i: (i, 0)),       # x tiles
                pl.BlockSpec((1, F_pad), lambda i: (0, 0)),            # w resident
                pl.BlockSpec(memory_space=pltpu.MemorySpace.SMEM),     # bias scalar
            ],
            out_specs=pl.BlockSpec((1, tile_b), lambda i: (0, i)),     # lane-dense
        ),
        compiler_params=pltpu.CompilerParams(
            dimension_semantics=("parallel",),   # batch tiles independent
            vmem_limit_bytes=int(vmem_limit),
        ),
    )(x, weight, bias)

    return out.reshape(B, 1)


if __name__ == "__main__":
    # Run the wrapper under jit so the tiny cast/pad/reshape XLA ops fuse.
    fwd = jax.jit(logistic_regression)

    # Exact inputs from the PyTorch script.
    x = jnp.array([[0.2, 0.4, 0.6],
                   [0.8, 0.6, 0.4],
                   [0.1, 0.3, 0.5]], dtype=jnp.float32)
    input_size = x.shape[1]

    # Deterministic nn.Linear-style init: U(-1/sqrt(fan_in), +1/sqrt(fan_in)).
    key = jax.random.PRNGKey(0)
    k_w, k_b = jax.random.split(key)
    bound = 1.0 / float(input_size) ** 0.5
    weight = jax.random.uniform(k_w, (1, input_size), jnp.float32, -bound, bound)
    bias = jax.random.uniform(k_b, (1,), jnp.float32, -bound, bound)

    out = jax.block_until_ready(fwd(x, weight, bias))
    ref = jax.nn.sigmoid(x @ weight.T + bias)
    assert out.shape == (x.shape[0], 1)
    assert jnp.allclose(out, ref, atol=1e-6), (out, ref)

    # Bigger case: lane-aligned F (no-pad fast path), multi-tile ragged batch.
    Fb, Bb = 256, 1100
    kx, kw, kb = jax.random.split(jax.random.PRNGKey(1), 3)
    xb = jax.random.normal(kx, (Bb, Fb), jnp.float32)
    bb = 1.0 / float(Fb) ** 0.5
    wb = jax.random.uniform(kw, (1, Fb), jnp.float32, -bb, bb)
    bvb = jax.random.uniform(kb, (1,), jnp.float32, -bb, bb)
    out_b = jax.block_until_ready(fwd(xb, wb, bvb))
    ref_b = jax.nn.sigmoid(xb @ wb.T + bvb)
    assert out_b.shape == (Bb, 1)
    assert jnp.allclose(out_b, ref_b, atol=2e-3), float(jnp.abs(out_b - ref_b).max())

    print("KERNEL_OK")
</pallas_src>

<mosaic_0001>
module attributes {stable_mosaic.version = 11 : i64} {
  func.func @_logreg_kernel(%arg0: i32, %arg1: memref<128x128xf32, #tpu.memory_space<vmem>>, %arg2: memref<1x128xf32, #tpu.memory_space<vmem>>, %arg3: memref<1xf32, #tpu.memory_space<smem>>, %arg4: memref<1x128xf32, #tpu.memory_space<vmem>>) attributes {dimension_semantics = [#tpu.dimension_semantics<parallel>], iteration_bounds = array<i64: 1>, scalar_prefetch = 0 : i64, scratch_operands = 0 : i64, tpu.core_type = #tpu.core_type<tc>, window_params = [{transform_indices = @transform_0, window_bounds = array<i64: 128, 128>}, {pipeline_mode = #tpu.pipeline_mode<synchronous>, transform_indices = @transform_1, window_bounds = array<i64: 1, 128>}, {transform_indices = @transform_2, window_bounds = array<i64: 1>}, {transform_indices = @transform_3, window_bounds = array<i64: 1, 128>}]} {
    %c0 = arith.constant 0 : index
    %c0_0 = arith.constant 0 : index
    %0 = vector.load %arg2[%c0, %c0_0] : memref<1x128xf32, #tpu.memory_space<vmem>>, vector<1x128xf32>
    %c0_1 = arith.constant 0 : index
    %c0_2 = arith.constant 0 : index
    %1 = vector.load %arg1[%c0_1, %c0_2] : memref<128x128xf32, #tpu.memory_space<vmem>>, vector<128x128xf32>
    %cst = arith.constant dense<0.000000e+00> : vector<1x128xf32>
    %2 = tpu.matmul %0, %1, %cst {dimension_numbers = #tpu.dot_dimension_numbers<[1], [1], [0], [0], [0, 0, 1, 0], [], []>} : vector<1x128xf32>, vector<128x128xf32>, vector<1x128xf32> -> vector<1x128xf32>
    %c0_3 = arith.constant 0 : index
    %3 = memref.load %arg3[%c0_3] : memref<1xf32, #tpu.memory_space<smem>>
    %4 = vector.broadcast %3 : f32 to vector<1x128xf32>
    %5 = arith.addf %2, %4 : vector<1x128xf32>
    %6 = arith.negf %5 : vector<1x128xf32>
    %7 = math.exp %6 : vector<1x128xf32>
    %cst_4 = arith.constant 1.000000e+00 : f32
    %8 = vector.broadcast %cst_4 : f32 to vector<1x128xf32>
    %9 = arith.addf %8, %7 : vector<1x128xf32>
    %10 = arith.divf %8, %9 : vector<1x128xf32>
    %c0_5 = arith.constant 0 : index
    %c0_6 = arith.constant 0 : index
    %11 = vector.load %arg4[%c0_5, %c0_6] : memref<1x128xf32, #tpu.memory_space<vmem>>, vector<1x128xf32>
    tpu.vector_store %arg4[%c0_5, %c0_6], %10 {strides = array<i32>} : memref<1x128xf32, #tpu.memory_space<vmem>>, vector<1x128xf32>,
    return
  }
  func.func @transform_0(%arg0: i32) -> (i32, i32) {
    %c0_i32 = arith.constant 0 : i32
    %c0_i32_0 = arith.constant 0 : i32
    return %arg0, %c0_i32 : i32, i32
  }
  func.func @transform_1(%arg0: i32) -> (i32, i32) {
    %c0_i32 = arith.constant 0 : i32
    %c0_i32_0 = arith.constant 0 : i32
    %c0_i32_1 = arith.constant 0 : i32
    return %c0_i32, %c0_i32_0 : i32, i32
  }
  func.func @transform_2(%arg0: i32) -> i32 {
    %c0_i32 = arith.constant 0 : i32
    %c0_i32_0 = arith.constant 0 : i32
    return %c0_i32 : i32
  }
  func.func @transform_3(%arg0: i32) -> (i32, i32) {
    %c0_i32 = arith.constant 0 : i32
    %c0_i32_0 = arith.constant 0 : i32
    return %c0_i32, %arg0 : i32, i32
  }
}

</mosaic_0001>

<bundles_post_ra>
// kernel: logistic_regression.1
= control target key start
LH: loop header
LB: loop body
LE: loop exit
PB: predicated region body
PF: predicated region fallthrough
CT: control target
= control target key end

     0   :  { %v235_v2 = vmov 0.0|0.0   ;;  %vm236_vm0 = vmmov 0   ;;  %v237_v4 = vmov 0.0   ;;  %s325_s0 = inlined_call_operand.vmem [shape: f32[3,128], index: 0, kind: input, shape index: {}]   ;;  %s326_s1 = inlined_call_operand.vmem [shape: f32[1,128], index: 1, kind: input, shape index: {}]   ;;  %s327_s2 = inlined_call_operand.<no memory space> [shape: f32[1], index: 2, kind: input, shape index: {}]   ;;  %s328_s3 = inlined_call_operand.hbm [shape: f32[1,3], index: 3, kind: output, shape index: {}]  }
   0x1   :  { %v17_v0 = vld [vmem:[%s325_s0] sm:$0xff]  ;;  %v18_v1 = vld [vmem:[%s325_s0 + $0x8] sm:$0xff]  ;;  %179 = vmatprep.subr.bf16.mxu0 %v235_v2  ;;  %176 = vmatprep.mubr.msk.f32.mxu0 %vm236_vm0, %v237_v4  ;;  %v19_v5 = vld [vmem:[%s325_s0 + $0x10] sm:$0xff] }
   0x2   :  { %v180_v3 = vpack.c.bf16 %v18_v1, %v17_v0  ;;  %v20_v6 = vld [vmem:[%s325_s0 + $0x18] sm:$0xff] }
   0x4   :  { %181 = vmatpush3.bf16.xpose.msra.mxu0 %v180_v3 }
   0x5   :  { %182 = vmatprep.subr.bf16.mxu0 %v235_v2 }
   0x6   :  { %9 = vsyncpa [#allocation4], 0  ;;  %v183_v7 = vpack.c.bf16 %v20_v6, %v19_v5  ;;  %v21_v8 = vld [vmem:[%s325_s0 + $0x20] sm:$0xff]  ;;  %v22_v9 = vld [vmem:[%s325_s0 + $0x28] sm:$0xff]  ;;  %v34_v27 = vstv %s327_s2 }
   0x7   :  { %v186_v10 = vpack.c.bf16 %v22_v9, %v21_v8  ;;  %v23_v11 = vld [vmem:[%s325_s0 + $0x30] sm:$0xff]  ;;  %v24_v12 = vld [vmem:[%s325_s0 + $0x38] sm:$0xff]  ;;  %v25_v14 = vld [vmem:[%s325_s0 + $0x40] sm:$0xff] }
   0x8   :  { %v189_v13 = vpack.c.bf16 %v24_v12, %v23_v11  ;;  %v26_v15 = vld [vmem:[%s325_s0 + $0x48] sm:$0xff]  ;;  %v27_v17 = vld [vmem:[%s325_s0 + $0x50] sm:$0xff]  ;;  %v28_v18 = vld [vmem:[%s325_s0 + $0x58] sm:$0xff] }
   0x9   :  { %v192_v16 = vpack.c.bf16 %v26_v15, %v25_v14  ;;  %v195_v19 = vpack.c.bf16 %v28_v18, %v27_v17  ;;  %v29_v20 = vld [vmem:[%s325_s0 + $0x60] sm:$0xff]  ;;  %v30_v21 = vld [vmem:[%s325_s0 + $0x68] sm:$0xff]  ;;  %v31_v23 = vld [vmem:[%s325_s0 + $0x70] sm:$0xff] }
   0xa   :  { %v198_v22 = vpack.c.bf16 %v30_v21, %v29_v20  ;;  %v32_v24 = vld [vmem:[%s325_s0 + $0x78] sm:$0xff]  ;;  %v16_v26 = vld [vmem:[%s326_s1] sm:$0x1]  ;;  %s238_s0 = smov [#allocation3]  }
   0xb   :  { %v201_v25 = vpack.c.bf16 %v32_v24, %v31_v23  ;;  %s118_s21 = sshll.u32 %s238_s0, 4  ;;  %s119_s21 = int_to_ptr.vmem [resolvable:$true] %s118_s21 }
   0xc   :  { %184 = vmatpush3.bf16.xpose.msra.mxu0 %v183_v7  ;;  %s211_s22 = scalar_lea.vmem %s119_s21, 16  ;;  %s215_s1 = scalar_lea.vmem %s119_s21, 32 }
   0xd   :  { %185 = vmatprep.subr.bf16.mxu0 %v235_v2  ;;  %p212_p0 = scmp.ne.s32.totalorder %s119_s21, %s211_s22  ;;  %p216_p1 = scmp.lt.s32.totalorder %s119_s21, %s119_s21 }
   0xe   :  { %p217_p2 = scmp.lt.s32.totalorder %s215_s1, %s211_s22 }
  0x10   :  { %p218_p3 = por %p217_p2, %p216_p1 }
  0x12   :  { %p219_p4 = pnand %p218_p3, %p212_p0 }
  0x14   :  { %187 = vmatpush3.bf16.xpose.msra.mxu0 %v186_v10 }
  0x15   :  { %188 = vmatprep.subr.bf16.mxu0 %v235_v2 }
  0x1c   :  { %190 = vmatpush3.bf16.xpose.msra.mxu0 %v189_v13 }
  0x1d   :  { %191 = vmatprep.subr.bf16.mxu0 %v235_v2 }
  0x24   :  { %193 = vmatpush3.bf16.xpose.msra.mxu0 %v192_v16 }
  0x25   :  { %194 = vmatprep.subr.bf16.mxu0 %v235_v2 }
  0x2c   :  { %196 = vmatpush3.bf16.xpose.msra.mxu0 %v195_v19 }
  0x2d   :  { %197 = vmatprep.subr.bf16.mxu0 %v235_v2 }
  0x34   :  { %199 = vmatpush3.bf16.xpose.msra.mxu0 %v198_v22 }
  0x35   :  { %200 = vmatprep.subr.bf16.mxu0 %v235_v2 }
  0x3c   :  { %202 = vmatpush3.bf16.xpose.msra.mxu0 %v201_v25 }
  0x43   :  { %177 = vmatmul.mubr.f32.vlgmr.msra.gmra.mrb[0].mxu0 %v16_v26 }
 0x116   :  { %v101_v28 = vpop.f32.mrb[0].mxu0 }
 0x117   :  { %v102_v29 = vadd.f32 %v101_v28, %v34_v27  ;;  %v178_v30 = vpop.f32.mrb[1].mxu0 }
 0x119   :  { %v126_v31 = vmul.f32 -1.442695, %v102_v29 }
 0x11b   :  { %207 = vpow2.f32 %v126_v31 }
 0x125   :  { %v208_v32 = vpop.eup %207 }
 0x126   :  { %v108_v33 = vadd.f32 1.0, %v208_v32 }
 0x128   :  { %209 = vrcp.f32 %v108_v33 }
 0x132   :  { %v210_v34 = vpop.eup %209 }
 0x133   :  { %111 = vst [vmem:[#allocation3] sm:$0x1] %v210_v34 }
 0x134   :  { %222 = shalt.err (!%p219_p4)
}
 0x135   :  { %s223_s24 = scalar_lea.hbm %s328_s3, 16 }
 0x136   :  { %p224_p5 = scmp.ne.s32.totalorder %s328_s3, %s223_s24  ;;  %p227_p6 = scmp.lt.u32.totalorder %s223_s24, %s328_s3 }
 0x138   :  { %p229_p7 = pnand %p227_p6, %p224_p5 }
 0x13a   :  { %232 = shalt.err (!%p229_p7)
}
 0x13b   :  { %121 = dma.vmem_to_hbm [thread:$0]  %s119_s21, 16, %s328_s3, [#allocation4]  }
 0x13c   :  { %233 = dma.done.wait [#allocation4], 16  }
 0x13d   :  { %234 = vsyncadd [#allocation4], 4294967280 }
 0x13e   :  { %125 = vsyncpa [#allocation4], 1 }

</bundles_post_ra>
